<compile_context>
chip_gen: v7x
topology: tpu7x:2x2x1
jax: 0.10.0
libtpu: 0.0.40
codegen_flags: <defaults>
</compile_context>

<pallas_src>
import jax
import jax.numpy as jnp
from jax.experimental import pallas as pl
from jax.experimental.pallas import tpu as pltpu


def _rescale_kernel(w_ref, x_ref, o_ref):
    # w_ref: (tm, 1), x_ref/o_ref: (tm, tn).  Broadcast multiply on the VPU;
    # explicit cast so mixed dtypes (e.g. f32 weight * bf16 x) stay well-defined.
    o_ref[...] = (x_ref[...] * w_ref[...]).astype(o_ref.dtype)


def rescale(x: jax.Array, weight: jax.Array,
            *, row_tile: int = 512, col_tile: int = 2048) -> jax.Array:
    """Per-channel rescale: weight (1, C, 1) * x (N, C, L)."""
    N, C, L = x.shape
    assert weight.shape == (1, C, 1), weight.shape

    rows = N * C
    # Lane-dense 2D view: one row per (batch, channel), length on the lanes.
    x2 = x.reshape(rows, L)
    # Per-row weight column: channel weights repeated across the batch.
    w2 = jnp.broadcast_to(weight.reshape(1, C), (N, C)).reshape(rows, 1)

    # Tile sizes: clamp to full dims for small problems (valid per the tiling
    # rule "divisible by (8,128) OR equal to the full dim"); otherwise use
    # 512 x 2048 f32 (~4 MiB) tiles -> ~16 MiB double-buffered in+out, which
    # fits every generation's VMEM including v7x's 64 MiB.
    tm = rows if rows < row_tile else row_tile
    tn = L if L < col_tile else col_tile
    grid = (pl.cdiv(rows, tm), pl.cdiv(L, tn))

    out2 = pl.pallas_call(
        _rescale_kernel,
        out_shape=jax.ShapeDtypeStruct((rows, L), x.dtype),
        grid=grid,
        in_specs=[
            # Weight: same row-block for every length tile (stays resident).
            pl.BlockSpec((tm, 1), lambda i, j: (i, 0)),
            pl.BlockSpec((tm, tn), lambda i, j: (i, j)),
        ],
        out_specs=pl.BlockSpec((tm, tn), lambda i, j: (i, j)),
        compiler_params=pltpu.CompilerParams(
            # Both axes independent -> shard across v7x's 2 TensorCores.
            dimension_semantics=("parallel", "parallel"),
            vmem_limit_bytes=64 * 1024 * 1024,
        ),
    )(w2, x2)

    return out2.reshape(N, C, L)


if __name__ == "__main__":
    key = jax.random.PRNGKey(0)
    kx, kw, kx2 = jax.random.split(key, 3)

    # Small shapes consistent with the module: batch=2, channels=4, seq=16.
    N, C, L = 2, 4, 16
    x = jax.random.normal(kx, (N, C, L), dtype=jnp.float32)

    # Module init is ones(1, C, 1); perturb deterministically so the
    # per-channel broadcast multiply is actually exercised.
    weight = jnp.ones((1, C, 1), dtype=jnp.float32) \
        + 0.1 * jax.random.normal(kw, (1, C, 1), dtype=jnp.float32)

    out = jax.block_until_ready(rescale(x, weight))
    ref = weight * x
    assert out.shape == x.shape and out.dtype == x.dtype
    assert jnp.allclose(out, ref, atol=1e-6, rtol=1e-6)

    # Second (still small) check with a lane-dense length to exercise the
    # 128-multiple-lane path of the same kernel.
    L2 = 256
    x_b = jax.random.normal(kx2, (N, C, L2), dtype=jnp.float32)
    out_b = jax.block_until_ready(rescale(x_b, weight))
    ref_b = weight * x_b
    assert jnp.allclose(out_b, ref_b, atol=1e-6, rtol=1e-6)

    print("KERNEL_OK")
</pallas_src>

<mosaic_0001>
module attributes {stable_mosaic.version = 11 : i64} {
  func.func @_rescale_kernel(%arg0: i32, %arg1: i32, %arg2: memref<8x1xf32, #tpu.memory_space<vmem>>, %arg3: memref<8x16xf32, #tpu.memory_space<vmem>>, %arg4: memref<8x16xf32, #tpu.memory_space<vmem>>) attributes {dimension_semantics = [#tpu.dimension_semantics<parallel>, #tpu.dimension_semantics<parallel>], iteration_bounds = array<i64: 1, 1>, scalar_prefetch = 0 : i64, scratch_operands = 0 : i64, tpu.core_type = #tpu.core_type<tc>, window_params = [{transform_indices = @transform_0, window_bounds = array<i64: 8, 1>}, {transform_indices = @transform_1, window_bounds = array<i64: 8, 16>}, {transform_indices = @transform_2, window_bounds = array<i64: 8, 16>}]} {
    %c0 = arith.constant 0 : index
    %c0_0 = arith.constant 0 : index
    %0 = vector.load %arg3[%c0, %c0_0] : memref<8x16xf32, #tpu.memory_space<vmem>>, vector<8x16xf32>
    %c0_1 = arith.constant 0 : index
    %c0_2 = arith.constant 0 : index
    %1 = vector.load %arg2[%c0_1, %c0_2] : memref<8x1xf32, #tpu.memory_space<vmem>>, vector<8x1xf32>
    %2 = vector.broadcast %1 : vector<8x1xf32> to vector<8x16xf32>
    %3 = arith.mulf %0, %2 : vector<8x16xf32>
    %c0_3 = arith.constant 0 : index
    %c0_4 = arith.constant 0 : index
    %4 = vector.load %arg4[%c0_3, %c0_4] : memref<8x16xf32, #tpu.memory_space<vmem>>, vector<8x16xf32>
    tpu.vector_store %arg4[%c0_3, %c0_4], %3 {strides = array<i32>} : memref<8x16xf32, #tpu.memory_space<vmem>>, vector<8x16xf32>,
    return
  }
  func.func @transform_0(%arg0: i32, %arg1: i32) -> (i32, i32) {
    %c0_i32 = arith.constant 0 : i32
    %c0_i32_0 = arith.constant 0 : i32
    return %arg0, %c0_i32 : i32, i32
  }
  func.func @transform_1(%arg0: i32, %arg1: i32) -> (i32, i32) {
    %c0_i32 = arith.constant 0 : i32
    return %arg0, %arg1 : i32, i32
  }
  func.func @transform_2(%arg0: i32, %arg1: i32) -> (i32, i32) {
    %c0_i32 = arith.constant 0 : i32
    return %arg0, %arg1 : i32, i32
  }
}

</mosaic_0001>

<bundles_post_ra>
// kernel: tpu_custom_call.1
= control target key start
LH: loop header
LB: loop body
LE: loop exit
PB: predicated region body
PF: predicated region fallthrough
CT: control target
= control target key end

     0   :  { %7 = vsyncpa [#allocation3], 0  ;;  %s194_s0 = inlined_call_operand.hbm [shape: f32[8,1], index: 0, kind: input, shape index: {}]   ;;  %s195_s1 = inlined_call_operand.hbm [shape: f32[8,16], index: 1, kind: input, shape index: {}]   ;;  %s196_s2 = inlined_call_operand.hbm [shape: f32[8,16], index: 2, kind: output, shape index: {}]  }
   0x1   :  { %8 = vsyncpa [#allocation6], 0 }
   0x2   :  { %9 = vsyncpa [#allocation4], 0  ;;  %s139_s9 = smov [#allocation2]   ;;  %s140_s11 = smov [#allocation5]  }
   0x3   :  { %s16_s10 = sshll.u32 %s139_s9, 4  ;;  %s26_s12 = sshll.u32 %s140_s11, 4  ;;  %s17_s10 = int_to_ptr.vmem [resolvable:$true] %s16_s10  ;;  %s27_s12 = int_to_ptr.vmem [resolvable:$true] %s26_s12 }
   0x4   :  { %s67_s15 = scalar_lea.hbm %s194_s0, 128 }
   0x5   :  { %p68_p0 = scmp.ne.s32.totalorder %s194_s0, %s67_s15  ;;  %p71_p1 = scmp.lt.u32.totalorder %s67_s15, %s194_s0 }
   0x7   :  { %p73_p2 = pnand %p71_p1, %p68_p0 }
   0x9   :  { %76 = shalt.err (!%p73_p2)
}
   0xa   :  { %s77_s20 = scalar_lea.vmem %s17_s10, 128  ;;  %p82_p4 = scmp.lt.s32.totalorder %s17_s10, %s17_s10 }
   0xb   :  { %p78_p3 = scmp.ne.s32.totalorder %s17_s10, %s77_s20  ;;  %p83_p5 = scmp.lt.s32.totalorder %s77_s20, %s77_s20 }
   0xd   :  { %p84_p6 = por %p83_p5, %p82_p4 }
   0xf   :  { %p85_p7 = pnand %p84_p6, %p78_p3 }
  0x11   :  { %88 = shalt.err (!%p85_p7)
}
  0x12   :  { %19 = dma.hbm_to_vmem [thread:$0]  %s194_s0, 128, %s17_s10, [#allocation3]  }
  0x13   :  { %s89_s25 = scalar_lea.hbm %s195_s1, 128 }
  0x14   :  { %p90_p8 = scmp.ne.s32.totalorder %s195_s1, %s89_s25  ;;  %p93_p9 = scmp.lt.u32.totalorder %s89_s25, %s195_s1 }
  0x16   :  { %p95_p10 = pnand %p93_p9, %p90_p8 }
  0x18   :  { %98 = shalt.err (!%p95_p10)
}
  0x19   :  { %s99_s30 = scalar_lea.vmem %s27_s12, 128  ;;  %p104_p12 = scmp.lt.s32.totalorder %s27_s12, %s27_s12 }
  0x1a   :  { %p100_p11 = scmp.ne.s32.totalorder %s27_s12, %s99_s30  ;;  %p105_p13 = scmp.lt.s32.totalorder %s99_s30, %s99_s30 }
  0x1c   :  { %p106_p0 = por %p105_p13, %p104_p12 }
  0x1e   :  { %p107_p1 = pnand %p106_p0, %p100_p11 }
  0x20   :  { %110 = shalt.err (!%p107_p1)
}
  0x21   :  { %29 = dma.hbm_to_vmem [thread:$0]  %s195_s1, 128, %s27_s12, [#allocation6]  }
  0x22   :  { %133 = dma.done.wait [#allocation3], 128  }
  0x23   :  { %134 = vsyncadd [#allocation3], 4294967168 }
  0x24   :  { %135 = dma.done.wait [#allocation6], 128  }
  0x25   :  { %136 = vsyncadd [#allocation6], 4294967168  ;;  %v141_v0 = vmov 0   ;;  %v37_v1 = vld [vmem:[#allocation2] sm:$0xff]  ;;  %v36_v2 = vld [vmem:[#allocation5] sm:$0xff]  ;;  %s142_s4 = smov [#allocation7]  }
  0x26   :  { %66 = vset.pattern.permute.xlu0 %v141_v0  ;;  %s52_s5 = sshll.u32 %s142_s4, 4  ;;  %vm44_vm0 = vcmask 130048   ;;  %s53_s5 = int_to_ptr.vmem [resolvable:$true] %s52_s5 }
  0x27   :  { %40 = vperm.xlu0 %66, %v37_v1   ;;  %s111_s6 = scalar_lea.vmem %s53_s5, 128  ;;  %p116_p3 = scmp.lt.s32.totalorder %s53_s5, %s53_s5 }
  0x28   :  { %p112_p2 = scmp.ne.s32.totalorder %s53_s5, %s111_s6  ;;  %p117_p4 = scmp.lt.s32.totalorder %s111_s6, %s111_s6 }
  0x2a   :  { %p118_p5 = por %p117_p4, %p116_p3 }
  0x2c   :  { %p119_p6 = pnand %p118_p5, %p112_p2 }
  0xa6   :  { %v41_v3 = vpop.permute.xlu0 %40 }
  0xa7   :  { %v43_v4 = vmul.f32 %v41_v3, %v36_v2 }
  0xa9   :  { %45 = vst.msk [vmem:[#allocation7] sm:$0xff] %vm44_vm0, %v43_v4 }
  0xaa   :  { %122 = shalt.err (!%p119_p6)
}
  0xab   :  { %s123_s8 = scalar_lea.hbm %s196_s2, 128 }
  0xac   :  { %p124_p7 = scmp.ne.s32.totalorder %s196_s2, %s123_s8  ;;  %p127_p8 = scmp.lt.u32.totalorder %s123_s8, %s196_s2 }
  0xae   :  { %p129_p9 = pnand %p127_p8, %p124_p7 }
  0xb0   :  { %132 = shalt.err (!%p129_p9)
}
  0xb1   :  { %55 = dma.vmem_to_hbm [thread:$0]  %s53_s5, 128, %s196_s2, [#allocation4]  }
  0xb2   :  { %137 = dma.done.wait [#allocation4], 128  }
  0xb3   :  { %138 = vsyncadd [#allocation4], 4294967168 }
  0xb4   :  { %59 = vsyncpa [#allocation3], 1 }
  0xb5   :  { %60 = vsyncpa [#allocation6], 1 }
  0xb6   :  { %61 = vsyncpa [#allocation4], 1 }

</bundles_post_ra>
